<compile_context>
chip_gen: v6e
topology: v6e:2x2x1
jax: 0.10.0
libtpu: 0.0.40
codegen_flags: <defaults>
</compile_context>

<pallas_src>
import functools

import jax
import jax.numpy as jnp
import numpy as np
from jax.experimental import pallas as pl
from jax.experimental.pallas import tpu as pltpu


def _round_up(x: int, m: int) -> int:
    return (x + m - 1) // m * m


# --------------------------------------------------------------------------
# Kernel 1: global average pool over spatial rows + squeeze/excite MLP.
# --------------------------------------------------------------------------
def _ca_pool_excite_kernel(x_ref, w1_ref, w2_ref, y_ref, acc_ref, *, inv_hw):
    r = pl.program_id(1)

    @pl.when(r == 0)
    def _init():
        acc_ref[...] = jnp.zeros_like(acc_ref)

    # Sublane reduction of this spatial tile; accumulate in f32.
    x_tile = x_ref[0].astype(jnp.float32)                    # (TR, Cp)
    acc_ref[...] += jnp.sum(x_tile, axis=0, keepdims=True)   # (1, Cp)

    @pl.when(r == pl.num_programs(1) - 1)
    def _excite():
        mean = acc_ref[...] * inv_hw                         # (1, Cp) f32
        h = jnp.dot(mean, w1_ref[...], preferred_element_type=jnp.float32)
        h = jnp.maximum(h, 0.0)                              # ReLU
        z = jnp.dot(h, w2_ref[...], preferred_element_type=jnp.float32)
        attn = jax.nn.sigmoid(z)                             # EUP path
        y_ref[...] = attn.reshape(y_ref.shape).astype(y_ref.dtype)


# --------------------------------------------------------------------------
# Kernel 2: broadcast channel-wise rescale of x.
# --------------------------------------------------------------------------
def _ca_scale_kernel(x_ref, y_ref, o_ref):
    x = x_ref[...].astype(jnp.float32)      # (1, TR, Cp)
    y = y_ref[...]                          # (1, 1, Cp) f32, VMEM-resident
    o_ref[...] = (x * y).astype(o_ref.dtype)


# --------------------------------------------------------------------------
# Wrapper matching CALayer.forward (NCHW in, NCHW out).
# --------------------------------------------------------------------------
def ca_layer_pallas(x, w1, w2, *, row_tile=512):
    """x: (N, C, H, W); w1: (C//r, C); w2: (C, C//r). bias=False."""
    N, C, H, W = x.shape
    Cr = w1.shape[0]
    rows = H * W

    Cp = _round_up(C, 128)          # lane-dense channels
    Hp = _round_up(Cr, 128)         # pad hidden for the tiny matmuls
    TR = min(row_tile, _round_up(rows, 8))
    Rp = _round_up(rows, TR)

    # NCHW -> (N, H*W, C), zero-pad rows and channels.
    xr = jnp.transpose(x, (0, 2, 3, 1)).reshape(N, rows, C)
    xr = jnp.pad(xr, ((0, 0), (0, Rp - rows), (0, Cp - C)))

    # Conv 1x1 weights -> right-multiply matrices, zero-padded.
    w1t = jnp.pad(w1.T.astype(jnp.float32), ((0, Cp - C), (0, Hp - Cr)))   # (Cp, Hp)
    w2t = jnp.pad(w2.T.astype(jnp.float32), ((0, Hp - Cr), (0, Cp - C)))   # (Hp, Cp)

    n_row_tiles = Rp // TR

    # ---- Pass 1: pooled mean -> excitation weights (N, 1, Cp) f32 ----------
    y = pl.pallas_call(
        functools.partial(_ca_pool_excite_kernel, inv_hw=1.0 / float(rows)),
        out_shape=jax.ShapeDtypeStruct((N, 1, Cp), jnp.float32),
        grid_spec=pltpu.PrefetchScalarGridSpec(
            num_scalar_prefetch=0,
            grid=(N, n_row_tiles),
            in_specs=[
                pl.BlockSpec((1, TR, Cp), lambda n, r: (n, r, 0)),
                pl.BlockSpec((Cp, Hp), lambda n, r: (0, 0)),
                pl.BlockSpec((Hp, Cp), lambda n, r: (0, 0)),
            ],
            out_specs=pl.BlockSpec((1, 1, Cp), lambda n, r: (n, 0, 0)),
            scratch_shapes=[pltpu.VMEM((1, Cp), jnp.float32)],
        ),
        compiler_params=pltpu.CompilerParams(
            dimension_semantics=("parallel", "arbitrary")),
    )(xr, w1t, w2t)

    # ---- Pass 2: x * sigmoid(...) broadcast over spatial ------------------
    out = pl.pallas_call(
        _ca_scale_kernel,
        out_shape=jax.ShapeDtypeStruct((N, Rp, Cp), x.dtype),
        grid_spec=pltpu.PrefetchScalarGridSpec(
            num_scalar_prefetch=0,
            grid=(N, n_row_tiles),
            in_specs=[
                pl.BlockSpec((1, TR, Cp), lambda n, r: (n, r, 0)),
                pl.BlockSpec((1, 1, Cp), lambda n, r: (n, 0, 0)),
            ],
            out_specs=pl.BlockSpec((1, TR, Cp), lambda n, r: (n, r, 0)),
        ),
        compiler_params=pltpu.CompilerParams(
            dimension_semantics=("parallel", "parallel")),
    )(xr, y)

    # Un-pad and return to NCHW.
    out = out[:, :rows, :C].reshape(N, H, W, C)
    return jnp.transpose(out, (0, 3, 1, 2))


# --------------------------------------------------------------------------
# Pure-JAX reference (mirrors the PyTorch CALayer forward).
# --------------------------------------------------------------------------
def ca_layer_ref(x, w1, w2):
    y = jnp.mean(x, axis=(2, 3), keepdims=True)              # (N, C, 1, 1)
    h = jnp.einsum("nchw,oc->nohw", y, w1)                   # 1x1 conv, no bias
    h = jnp.maximum(h, 0.0)
    z = jnp.einsum("nchw,oc->nohw", h, w2)
    return x * jax.nn.sigmoid(z)


if __name__ == "__main__":
    # Small shapes consistent with the module: channel=128, reduction=16 -> 8.
    N, C, H, W = 2, 128, 16, 16
    reduction = 16
    Cr = C // reduction

    key = jax.random.PRNGKey(0)
    kx, k1, k2 = jax.random.split(key, 3)
    x = jax.random.normal(kx, (N, C, H, W), dtype=jnp.float32)
    w1 = jax.random.normal(k1, (Cr, C), dtype=jnp.float32) * 0.1   # Conv2d(C, C/r, 1)
    w2 = jax.random.normal(k2, (C, Cr), dtype=jnp.float32) * 0.1   # Conv2d(C/r, C, 1)

    out = ca_layer_pallas(x, w1, w2)
    out = jax.block_until_ready(out)

    ref = jax.block_until_ready(ca_layer_ref(x, w1, w2))
    np.testing.assert_allclose(np.asarray(out), np.asarray(ref),
                               rtol=2e-5, atol=2e-5)

    print("KERNEL_OK")
</pallas_src>

<mosaic_0001>
module attributes {stable_mosaic.version = 11 : i64} {
  func.func @_ca_pool_excite_kernel(%arg0: i32, %arg1: i32, %arg2: memref<1x256x128xf32, #tpu.memory_space<vmem>>, %arg3: memref<128x128xf32, #tpu.memory_space<vmem>>, %arg4: memref<128x128xf32, #tpu.memory_space<vmem>>, %arg5: memref<1x1x128xf32, #tpu.memory_space<vmem>>, %arg6: memref<1x128xf32, #tpu.memory_space<vmem>>) attributes {dimension_semantics = [#tpu.dimension_semantics<parallel>, #tpu.dimension_semantics<arbitrary>], iteration_bounds = array<i64: 2, 1>, scalar_prefetch = 0 : i64, scratch_operands = 1 : i64, tpu.core_type = #tpu.core_type<tc>, window_params = [{transform_indices = @transform_0, window_bounds = array<i64: 1, 256, 128>}, {pipeline_mode = #tpu.pipeline_mode<synchronous>, transform_indices = @transform_1, window_bounds = array<i64: 128, 128>}, {pipeline_mode = #tpu.pipeline_mode<synchronous>, transform_indices = @transform_2, window_bounds = array<i64: 128, 128>}, {transform_indices = @transform_3, window_bounds = array<i64: 1, 1, 128>}]} {
    %c0_i32 = arith.constant 0 : i32
    %0 = arith.cmpi eq, %arg1, %c0_i32 : i32
    %1 = arith.extui %0 : i1 to i32
    %c0_i32_0 = arith.constant 0 : i32
    %2 = arith.cmpi ne, %1, %c0_i32_0 : i32
    scf.if %2 {
      %cst_9 = arith.constant 0.000000e+00 : f32
      %13 = vector.broadcast %cst_9 : f32 to vector<1x128xf32>
      %c0_10 = arith.constant 0 : index
      %c0_11 = arith.constant 0 : index
      %14 = vector.load %arg6[%c0_10, %c0_11] : memref<1x128xf32, #tpu.memory_space<vmem>>, vector<1x128xf32>
      tpu.vector_store %arg6[%c0_10, %c0_11], %13 {strides = array<i32>} : memref<1x128xf32, #tpu.memory_space<vmem>>, vector<1x128xf32>,
    } else {
    }
    %c0 = arith.constant 0 : index
    %c0_1 = arith.constant 0 : index
    %c0_2 = arith.constant 0 : index
    %3 = vector.load %arg2[%c0, %c0_1, %c0_2] : memref<1x256x128xf32, #tpu.memory_space<vmem>>, vector<1x256x128xf32>
    %4 = vector.shape_cast %3 : vector<1x256x128xf32> to vector<256x128xf32>
    %c0_3 = arith.constant 0 : index
    %c0_4 = arith.constant 0 : index
    %5 = vector.load %arg6[%c0_3, %c0_4] : memref<1x128xf32, #tpu.memory_space<vmem>>, vector<1x128xf32>
    %cst = arith.constant dense<0.000000e+00> : vector<128xf32>
    %6 = vector.multi_reduction <add>, %4, %cst [0] : vector<256x128xf32> to vector<128xf32>
    %7 = vector.shape_cast %6 : vector<128xf32> to vector<1x128xf32>
    %8 = arith.addf %5, %7 : vector<1x128xf32>
    %c0_5 = arith.constant 0 : index
    %c0_6 = arith.constant 0 : index
    %9 = vector.load %arg6[%c0_5, %c0_6] : memref<1x128xf32, #tpu.memory_space<vmem>>, vector<1x128xf32>
    tpu.vector_store %arg6[%c0_5, %c0_6], %8 {strides = array<i32>} : memref<1x128xf32, #tpu.memory_space<vmem>>, vector<1x128xf32>,
    %c0_i32_7 = arith.constant 0 : i32
    %10 = arith.cmpi eq, %arg1, %c0_i32_7 : i32
    %11 = arith.extui %10 : i1 to i32
    %c0_i32_8 = arith.constant 0 : i32
    %12 = arith.cmpi ne, %11, %c0_i32_8 : i32
    scf.if %12 {
      %c0_9 = arith.constant 0 : index
      %c0_10 = arith.constant 0 : index
      %13 = vector.load %arg6[%c0_9, %c0_10] : memref<1x128xf32, #tpu.memory_space<vmem>>, vector<1x128xf32>
      %cst_11 = arith.constant 3.906250e-03 : f32
      %14 = vector.broadcast %cst_11 : f32 to vector<1x128xf32>
      %15 = arith.mulf %13, %14 : vector<1x128xf32>
      %c0_12 = arith.constant 0 : index
      %c0_13 = arith.constant 0 : index
      %16 = vector.load %arg3[%c0_12, %c0_13] : memref<128x128xf32, #tpu.memory_space<vmem>>, vector<128x128xf32>
      %cst_14 = arith.constant dense<0.000000e+00> : vector<1x128xf32>
      %17 = tpu.matmul %15, %16, %cst_14 {dimension_numbers = #tpu.dot_dimension_numbers<[1], [0], [0], [1], [0, 0, 1, 1], [], []>} : vector<1x128xf32>, vector<128x128xf32>, vector<1x128xf32> -> vector<1x128xf32>
      %cst_15 = arith.constant 0.000000e+00 : f32
      %18 = vector.broadcast %cst_15 : f32 to vector<1x128xf32>
      %19 = arith.maximumf %17, %18 : vector<1x128xf32>
      %c0_16 = arith.constant 0 : index
      %c0_17 = arith.constant 0 : index
      %20 = vector.load %arg4[%c0_16, %c0_17] : memref<128x128xf32, #tpu.memory_space<vmem>>, vector<128x128xf32>
      %cst_18 = arith.constant dense<0.000000e+00> : vector<1x128xf32>
      %21 = tpu.matmul %19, %20, %cst_18 {dimension_numbers = #tpu.dot_dimension_numbers<[1], [0], [0], [1], [0, 0, 1, 1], [], []>} : vector<1x128xf32>, vector<128x128xf32>, vector<1x128xf32> -> vector<1x128xf32>
      %22 = arith.negf %21 : vector<1x128xf32>
      %23 = math.exp %22 : vector<1x128xf32>
      %cst_19 = arith.constant 1.000000e+00 : f32
      %24 = vector.broadcast %cst_19 : f32 to vector<1x128xf32>
      %25 = arith.addf %24, %23 : vector<1x128xf32>
      %26 = arith.divf %24, %25 : vector<1x128xf32>
      %27 = vector.shape_cast %26 : vector<1x128xf32> to vector<1x1x128xf32>
      %c0_20 = arith.constant 0 : index
      %c0_21 = arith.constant 0 : index
      %c0_22 = arith.constant 0 : index
      %28 = vector.load %arg5[%c0_20, %c0_21, %c0_22] : memref<1x1x128xf32, #tpu.memory_space<vmem>>, vector<1x1x128xf32>
      tpu.vector_store %arg5[%c0_20, %c0_21, %c0_22], %27 {strides = array<i32>} : memref<1x1x128xf32, #tpu.memory_space<vmem>>, vector<1x1x128xf32>,
    } else {
    }
    return
  }
  func.func @transform_0(%arg0: i32, %arg1: i32) -> (i32, i32, i32) {
    %c0_i32 = arith.constant 0 : i32
    %c0_i32_0 = arith.constant 0 : i32
    return %arg0, %arg1, %c0_i32 : i32, i32, i32
  }
  func.func @transform_1(%arg0: i32, %arg1: i32) -> (i32, i32) {
    %c0_i32 = arith.constant 0 : i32
    %c0_i32_0 = arith.constant 0 : i32
    %c0_i32_1 = arith.constant 0 : i32
    return %c0_i32, %c0_i32_0 : i32, i32
  }
  func.func @transform_2(%arg0: i32, %arg1: i32) -> (i32, i32) {
    %c0_i32 = arith.constant 0 : i32
    %c0_i32_0 = arith.constant 0 : i32
    %c0_i32_1 = arith.constant 0 : i32
    return %c0_i32, %c0_i32_0 : i32, i32
  }
  func.func @transform_3(%arg0: i32, %arg1: i32) -> (i32, i32, i32) {
    %c0_i32 = arith.constant 0 : i32
    %c0_i32_0 = arith.constant 0 : i32
    %c0_i32_1 = arith.constant 0 : i32
    return %arg0, %c0_i32, %c0_i32_0 : i32, i32, i32
  }
}

</mosaic_0001>

<bundles_post_ra>
// kernel: tpu_custom_call.1
= control target key start
LH: loop header
LB: loop body
LE: loop exit
PB: predicated region body
PF: predicated region fallthrough
CT: control target
= control target key end

     0   :  { %8 = vsyncpa [#allocation4], 0  ;;  %s1271_s0 = inlined_call_operand.hbm [shape: f32[2,256,128], index: 0, kind: input, shape index: {}]   ;;  %s1272_s1 = inlined_call_operand.hbm [shape: f32[128,128], index: 1, kind: input, shape index: {}]   ;;  %s1273_s2 = inlined_call_operand.hbm [shape: f32[128,128], index: 2, kind: input, shape index: {}]   ;;  %s1274_s3 = inlined_call_operand.hbm [shape: f32[2,1,128], index: 3, kind: output, shape index: {}]  }
   0x1   :  { %10 = vsyncpa [#allocation4 + $0x1], 0 }
   0x2   :  { %11 = vsyncpa [#allocation7], 0 }
   0x3   :  { %12 = vsyncpa [#allocation5], 0 }
   0x4   :  { %14 = vsyncpa [#allocation5 + $0x1], 0  ;;  %s1012_s12 = smov 0   ;;  %s1014_s13 = smov 0  }
   0x5   :  { %s1016_s14 = smov 0   ;;  %s1018_s15 = smov 0  }
   0x6   :  { %s1020_s16 = smov 0   ;;  %s1022_s17 = smov 0  }
   0x7 LB: > { %s605_s18 = sadd.s32 4294967295, %s982_s17   ;;  %s606_s19 = sadd.s32 4294967294, %s982_s17   ;;  %s982_s17 = sphi %s1022_s17, %s20_s17   ;;  %s978_s16 = sphi %s1020_s16, %s1291_s16   ;;  %s974_s15 = sphi %s1018_s15, %s1290_s15   ;;  %s970_s14 = sphi %s1016_s14, %s1289_s14   ;;  %s966_s13 = sphi %s1014_s13, %s1288_s13   ;;  %s962_s12 = sphi %s1012_s12, %s1287_s12  }
   0x8   : > { %p54_p0 = scmp.ne.s32.totalorder %s966_s13, %s962_s12  ;;  %p1046_p1 = scmp.eq.s32.totalorder %s605_s18, 0 }
   0x9   : > { %p1050_p2 = scmp.eq.s32.totalorder %s605_s18, 1  ;;  %p126_p3 = scmp.eq.s32.totalorder %s606_s19, 1 }
   0xa   : > { %p1056_p4 = por %p1046_p1, %p54_p0  ;;  %p607_p5 = scmp.ge.s32.totalorder %s982_s17, 1 }
   0xb   : > { %p1061_p6 = por %p126_p3, %p54_p0  ;;  %p133_p7 = scmp.lt.s32.totalorder %s982_s17, 3 }
   0xc   : > { %s984_s25 = smov [#allocation6]   ;;  %s985_s28 = smov [#allocation8]  }
   0xd   : > { %s1279_s23 = scalar_select %p1061_p6, 1, 0 }
   0xe   : > { %p1066_p8 = pnand %p607_p5, %p133_p7  ;;  %s145_s26 = sshll.u32 %s984_s25, 4  ;;  %s146_s26 = int_to_ptr.vmem [resolvable:$true] %s145_s26 }
   0xf   : > { %s158_s29 = sshll.u32 %s985_s28, 4  ;;  %s829_s30 = scalar_lea.vmem %s146_s26, 2048  ;;  %s159_s29 = int_to_ptr.vmem [resolvable:$true] %s158_s29 }
  0x10   : > { %p739_p9 = pneg %p1066_p8  ;;  %p830_p13 = scmp.ne.s32.totalorder %s146_s26, %s829_s30 }
  0x11   : > { %p837_p5 = scmp.lt.s32.totalorder %s146_s26, %s146_s26  ;;  %p838_p7 = scmp.lt.s32.totalorder %s829_s30, %s829_s30 }
  0x12   : > { %p1075_p11 = pnand %p739_p9, %p1046_p1 }
  0x13   : > { %p839_p10 = por %p838_p7, %p837_p5 }
  0x14   : > { %p820_p12 = pneg %p1075_p11 }
  0x16   : > { %p832_p0 = pnand %p830_p13, %p820_p12 }
  0x18   : > { %p833_p3 = pneg %p832_p0 }
  0x1a   : > { %p840_p9 = pnand %p839_p10, %p833_p3 }
  0x1c   : > { %843 = shalt.err (!%p840_p9)
}
  0x1d   : > { %s1275_s4 = smov 128   ;;  %s987_s5 = smov 8  }
  0x1e   : > { %742 = dma.hbm_to_vmem [thread:$0]  (!%p1075_p11), %s1272_s1, 2048, %s146_s26, [#allocation7], %s1275_s4, %s1275_s4, %s987_s5  }
  0x1f   : > { %s855_s8 = scalar_lea.vmem %s159_s29, 2048  ;;  %p863_p10 = scmp.lt.s32.totalorder %s159_s29, %s159_s29 }
  0x20   : > { %p856_p13 = scmp.ne.s32.totalorder %s159_s29, %s855_s8  ;;  %p864_p3 = scmp.lt.s32.totalorder %s855_s8, %s855_s8 }
  0x22   : > { %p858_p0 = pnand %p856_p13, %p820_p12  ;;  %p865_p7 = por %p864_p3, %p863_p10 }
  0x24   : > { %p859_p5 = pneg %p858_p0 }
  0x26   : > { %p866_p9 = pnand %p865_p7, %p859_p5 }
  0x28   : > { %869 = shalt.err (!%p866_p9)
}
  0x29   : > { %745 = dma.hbm_to_vmem [thread:$0]  (!%p1075_p11), %s1273_s2, 2048, %s159_s29, [#allocation7], %s1275_s4, %s1275_s4, %s987_s5  }
  0x2a   : > { %s32_s11 = sadd.s32 1, %s978_s16  ;;  %s41_s18 = sadd.s32 1, %s970_s14 }
  0x2b   : > { %p34_p12 = scmp.ge.s32.totalorder %s32_s11, 2  ;;  %p48_p13 = scmp.ne.s32.totalorder %s970_s14, %s966_s13 }
  0x2c   : > { %p49_p0 = scmp.eq.s32.totalorder %s982_s17, 0  ;;  %p756_p5 = scmp.lt.s32.totalorder %s982_s17, 2 }
  0x2d   : > { %s1293_s11 = smov (%p34_p12, %s32_s11), 0  ;;  %p1113_p3 = por %p1050_p2, %p48_p13 }
  0x2e   : > { %p50_p10 = por %p49_p0, %p48_p13  ;;  %s36_s25 = ssub.s32 %s978_s16, %s1293_s11 }
  0x2f   : > { %s172_s26 = sand.u32 1, %s970_s14   ;;  %p39_p7 = scmp.eq.s32.totalorder %s36_s25, 0 }
  0x30   : > { %s611_s27 = sshll.u32 %s172_s26, 8  ;;  %s622_s28 = sshll.u32 %s978_s16, 12 }
  0x31   : > { %s1122_s29 = scalar_select %p39_p7, %s970_s14, %s41_s18  }
  0x32   : > { %s184_s7 = scalar_lea.hbm %s1271_s0, %s622_s28  ;;  %s176_s8 = scalar_lea.vmem [#allocation3], %s611_s27 }
  0x33   : > { %s185_s9 = sshll.u32 %s176_s8, 4  ;;  %p1129_p11 = pnand %p756_p5, %p50_p10  ;;  %s186_s9 = int_to_ptr.vmem [resolvable:$true] %s185_s9 }
  0x34   : > { %s173_s10 = scalar_lea.sflag [#allocation4], %s172_s26  ;;  %s883_s25 = scalar_lea.vmem %s186_s9, 4096 }
  0x35   : > { %p872_p2 = pneg %p1129_p11  ;;  %p884_p9 = scmp.ne.s32.totalorder %s186_s9, %s883_s25 }
  0x36   : > { %s988_s18 = smov [#allocation3]  }
  0x37   : > { %p886_p12 = pnand %p884_p9, %p872_p2  ;;  %s888_s4 = sshll.u32 %s988_s18, 4  ;;  %s889_s4 = int_to_ptr.vmem [resolvable:$false] %s888_s4 }
  0x38   : > { %s890_s28 = scalar_lea.vmem %s889_s4, 8192  ;;  %p891_p0 = scmp.lt.s32.totalorder %s186_s9, %s889_s4 }
  0x39   : > { %p887_p13 = pneg %p886_p12  ;;  %p892_p7 = scmp.lt.s32.totalorder %s890_s28, %s883_s25 }
  0x3b   : > { %p893_p6 = por %p892_p7, %p891_p0 }
  0x3d   : > { %p894_p5 = pnand %p893_p6, %p887_p13 }
  0x3f   : > { %897 = shalt.err (!%p894_p5)
}
  0x40   : > { %s1284_s27 = smov 128   ;;  %197 = sbr.rel (%p1066_p8) target bundleno = 594 (0x252), region = 32 }
  0x41   : > { %749 = dma.hbm_to_vmem [thread:$0]  (!%p1129_p11), %s184_s7, 4096, %s186_s9, %s173_s10, %s1284_s27, %s1284_s27, %s987_s5  }
  0x42   : > { %s1143_s26 = sand.u32 (!%p1066_p8), 1, %s966_s13  }
  0x43   : > { %s615_s4 = sshll.u32 (!%p1066_p8), %s1143_s26, 8  ;;  %s200_s30 = scalar_lea.sflag (!%p1066_p8), [#allocation4], %s1143_s26 }
  0x44   : > { %s1147_s6 = scalar_lea.vmem (!%p1066_p8), [#allocation3], %s615_s4 }
  0x45   : > { %949 = dma.done.wait (%p1056_p4), %s200_s30, 4096  }
  0x46   : > { %951 = vsyncadd (%p1056_p4), %s200_s30, 4294963200 }
  0x47   : > { %953 = dma.done.wait (%p1046_p1), [#allocation7], 4096  }
  0x48   : > { %955 = vsyncadd (%p1046_p1), [#allocation7], 4294963200  ;;  %v989_v0 = vmov 0.0   ;;  %vm990_vm0 = vmmov 0   ;;  %v331_v1 = vld [vmem:[#allocation6 + $0x78] sm:$0xff]  ;;  %v330_v2 = vld [vmem:[#allocation6 + $0x70] sm:$0xff] }
  0x49   : > { %657 = vmatprep.subr.mxu0 %v989_v0  ;;  %238 = vst [vmem:[#allocation2] sm:$0x1] %v989_v0  ;;  %689 = vmatprep.mubr.msk.f32.mxu0 %vm990_vm0, %v989_v0  ;;  %v329_v3 = vld [vmem:[#allocation6 + $0x68] sm:$0xff]  ;;  %v328_v4 = vld [vmem:[#allocation6 + $0x60] sm:$0xff]  ;;  %v327_v7 = vld [vmem:[#allocation6 + $0x58] sm:$0xff]  ;;  %s619_s20 = sshll.u32 %s974_s15, 4 }
  0x4a   : > { %692 = vmatprep.subr.mxu1 %v989_v0  ;;  %724 = vmatprep.mubr.msk.f32.mxu1 %vm990_vm0, %v989_v0  ;;  %v239_v5 = vld [vmem:[%s1147_s6] sm:$0xff]  ;;  %v240_v6 = vld [vmem:[%s1147_s6 + $0x8] sm:$0xff]  ;;  %v241_v8 = vld [vmem:[%s1147_s6 + $0x10] sm:$0xff]  ;;  %s232_s22 = scalar_lea.vmem [#allocation9], %s1143_s26  ;;  %s1229_s8 = scalar_lea.hbm %s1274_s3, %s619_s20 }
  0x4b   : > { %658 = vmatpush3.msra.mxu0 %v331_v1  ;;  %v272_v9 = vadd.f32 %v240_v6, %v239_v5  ;;  %v242_v10 = vld [vmem:[%s1147_s6 + $0x18] sm:$0xff]  ;;  %v326_v11 = vld [vmem:[#allocation6 + $0x50] sm:$0xff]  ;;  %v243_v13 = vld [vmem:[%s1147_s6 + $0x20] sm:$0xff]  ;;  %s509_s24 = sshll.u32 %s232_s22, 4  ;;  %s497_s9 = scalar_lea.sflag [#allocation5], %s1143_s26  ;;  %s510_s24 = int_to_ptr.vmem [resolvable:$true] %s509_s24 }
  0x4c   : > { %659 = vmatprep.subr.mxu0 %v989_v0  ;;  %v325_v14 = vld [vmem:[#allocation6 + $0x48] sm:$0xff]  ;;  %v324_v17 = vld [vmem:[#allocation6 + $0x40] sm:$0xff]  ;;  %v245_v19 = vld [vmem:[%s1147_s6 + $0x30] sm:$0xff]  ;;  %s898_s21 = scalar_lea.vmem %s510_s24, 16  ;;  %s991_s10 = smov [#allocation9]  }
  0x4d   : > { %660 = vmatpush3.msra.mxu0 %v330_v2  ;;  %v273_v12 = vadd.f32 %v272_v9, %v241_v8  ;;  %v244_v16 = vld [vmem:[%s1147_s6 + $0x28] sm:$0xff]  ;;  %v323_v20 = vld [vmem:[#allocation6 + $0x38] sm:$0xff]  ;;  %v322_v23 = vld [vmem:[#allocation6 + $0x30] sm:$0xff]  ;;  %p899_p1 = scmp.ne.s32.totalorder %s510_s24, %s898_s21  ;;  %s902_s25 = sshll.u32 %s991_s10, 4  ;;  %s903_s25 = int_to_ptr.vmem [resolvable:$false] %s902_s25 }
  0x4e   : > { %661 = vmatprep.subr.mxu0 %v989_v0  ;;  %v246_v22 = vld [vmem:[%s1147_s6 + $0x38] sm:$0xff]  ;;  %v417_v26 = vld [vmem:[#allocation8 + $0x70] sm:$0xff]  ;;  %v247_v27 = vld [vmem:[%s1147_s6 + $0x40] sm:$0xff]  ;;  %s904_s15 = scalar_lea.vmem %s903_s25, 32  ;;  %p905_p8 = scmp.lt.s32.totalorder %s510_s24, %s903_s25 }
  0x4f   : > { %662 = vmatpush3.msra.mxu0 %v329_v3  ;;  %v274_v15 = vadd.f32 %v273_v12, %v242_v10  ;;  %v418_v25 = vld [vmem:[#allocation8 + $0x78] sm:$0xff]  ;;  %v321_v28 = vld [vmem:[#allocation6 + $0x28] sm:$0xff]  ;;  %v320_v32 = vld [vmem:[#allocation6 + $0x20] sm:$0xff]  ;;  %p900_p4 = pnand %p899_p1, %p1113_p3  ;;  %p906_p10 = scmp.lt.s32.totalorder %s904_s15, %s898_s21 }
  0x50   : > { %663 = vmatprep.subr.mxu0 %v989_v0  ;;  %693 = vmatpush3.msra.mxu1 %v418_v25  ;;  %v416_v30 = vld [vmem:[#allocation8 + $0x68] sm:$0xff]  ;;  %v415_v34 = vld [vmem:[#allocation8 + $0x60] sm:$0xff]  ;;  %v249_v35 = vld [vmem:[%s1147_s6 + $0x50] sm:$0xff] }
  0x51   : > { %664 = vmatpush3.msra.mxu0 %v328_v4  ;;  %v275_v18 = vadd.f32 %v274_v15, %v243_v13  ;;  %694 = vmatprep.subr.mxu1 %v989_v0  ;;  %v248_v31 = vld [vmem:[%s1147_s6 + $0x48] sm:$0xff]  ;;  %v319_v36 = vld [vmem:[#allocation6 + $0x18] sm:$0xff]  ;;  %v318_v40 = vld [vmem:[#allocation6 + $0x10] sm:$0xff]  ;;  %p901_p6 = pneg %p900_p4  ;;  %p907_p11 = por %p906_p10, %p905_p8 }
  0x52   : > { %665 = vmatprep.subr.mxu0 %v989_v0  ;;  %695 = vmatpush3.msra.mxu1 %v417_v26  ;;  %v414_v38 = vld [vmem:[#allocation8 + $0x58] sm:$0xff]  ;;  %v413_v42 = vld [vmem:[#allocation8 + $0x50] sm:$0xff]  ;;  %v251_v43 = vld [vmem:[%s1147_s6 + $0x60] sm:$0xff] }
  0x53   : > { %666 = vmatpush3.msra.mxu0 %v327_v7  ;;  %v276_v21 = vadd.f32 %v275_v18, %v244_v16  ;;  %696 = vmatprep.subr.mxu1 %v989_v0  ;;  %v250_v39 = vld [vmem:[%s1147_s6 + $0x58] sm:$0xff]  ;;  %v317_v44 = vld [vmem:[#allocation6 + $0x8] sm:$0xff]  ;;  %v316_v48 = vld [vmem:[#allocation6] sm:$0xff]  ;;  %p908_p2 = pnand %p907_p11, %p901_p6 }
  0x54   : > { %667 = vmatprep.subr.mxu0 %v989_v0  ;;  %697 = vmatpush3.msra.mxu1 %v416_v30  ;;  %v412_v46 = vld [vmem:[#allocation8 + $0x48] sm:$0xff]  ;;  %v411_v50 = vld [vmem:[#allocation8 + $0x40] sm:$0xff]  ;;  %v253_v51 = vld [vmem:[%s1147_s6 + $0x70] sm:$0xff] }
  0x55   : > { %668 = vmatpush3.msra.mxu0 %v326_v11  ;;  %v277_v24 = vadd.f32 %v276_v21, %v245_v19  ;;  %698 = vmatprep.subr.mxu1 %v989_v0  ;;  %v252_v47 = vld [vmem:[%s1147_s6 + $0x68] sm:$0xff]  ;;  %v410_v53 = vld [vmem:[#allocation8 + $0x38] sm:$0xff]  ;;  %v409_v56 = vld [vmem:[#allocation8 + $0x30] sm:$0xff] }
  0x56   : > { %669 = vmatprep.subr.mxu0 %v989_v0  ;;  %699 = vmatpush3.msra.mxu1 %v415_v34  ;;  %v254_v54 = vld [vmem:[%s1147_s6 + $0x78] sm:$0xff]  ;;  %v255_v57 = vld [vmem:[%s1147_s6 + $0x80] sm:$0xff]  ;;  %v408_v59 = vld [vmem:[#allocation8 + $0x28] sm:$0xff] }
  0x57   : > { %670 = vmatpush3.msra.mxu0 %v325_v14  ;;  %v278_v29 = vadd.f32 %v277_v24, %v246_v22  ;;  %700 = vmatprep.subr.mxu1 %v989_v0  ;;  %v256_v60 = vld [vmem:[%s1147_s6 + $0x88] sm:$0xff]  ;;  %v407_v62 = vld [vmem:[#allocation8 + $0x20] sm:$0xff]  ;;  %v257_v63 = vld [vmem:[%s1147_s6 + $0x90] sm:$0xff] }
  0x58   : > { %671 = vmatprep.subr.mxu0 %v989_v0  ;;  %701 = vmatpush3.msra.mxu1 %v414_v38  ;;  %v406_v2 = vld [vmem:[#allocation8 + $0x18] sm:$0xff]  ;;  %v405_v5 = vld [vmem:[#allocation8 + $0x10] sm:$0xff]  ;;  %v259_v6 = vld [vmem:[%s1147_s6 + $0xa0] sm:$0xff] }
  0x59   : > { %672 = vmatpush3.msra.mxu0 %v324_v17  ;;  %v279_v33 = vadd.f32 %v278_v29, %v247_v27  ;;  %702 = vmatprep.subr.mxu1 %v989_v0  ;;  %v258_v3 = vld [vmem:[%s1147_s6 + $0x98] sm:$0xff]  ;;  %v260_v8 = vld [vmem:[%s1147_s6 + $0xa8] sm:$0xff]  ;;  %v261_v10 = vld [vmem:[%s1147_s6 + $0xb0] sm:$0xff] }
  0x5a   : > { %673 = vmatprep.subr.mxu0 %v989_v0  ;;  %703 = vmatpush3.msra.mxu1 %v413_v42  ;;  %v262_v12 = vld [vmem:[%s1147_s6 + $0xb8] sm:$0xff]  ;;  %v263_v14 = vld [vmem:[%s1147_s6 + $0xc0] sm:$0xff]  ;;  %v264_v16 = vld [vmem:[%s1147_s6 + $0xc8] sm:$0xff] }
  0x5b   : > { %674 = vmatpush3.msra.mxu0 %v323_v20  ;;  %v280_v37 = vadd.f32 %v279_v33, %v248_v31  ;;  %704 = vmatprep.subr.mxu1 %v989_v0  ;;  %v265_v18 = vld [vmem:[%s1147_s6 + $0xd0] sm:$0xff]  ;;  %v266_v20 = vld [vmem:[%s1147_s6 + $0xd8] sm:$0xff]  ;;  %v267_v22 = vld [vmem:[%s1147_s6 + $0xe0] sm:$0xff] }
  0x5c   : > { %675 = vmatprep.subr.mxu0 %v989_v0  ;;  %705 = vmatpush3.msra.mxu1 %v412_v46  ;;  %v268_v24 = vld [vmem:[%s1147_s6 + $0xe8] sm:$0xff]  ;;  %v269_v26 = vld [vmem:[%s1147_s6 + $0xf0] sm:$0xff]  ;;  %v403_v42 = vld [vmem:[#allocation8] sm:$0xff] }
  0x5d   : > { %676 = vmatpush3.msra.mxu0 %v322_v23  ;;  %v281_v41 = vadd.f32 %v280_v37, %v249_v35  ;;  %706 = vmatprep.subr.mxu1 %v989_v0 }
  0x5e   : > { %677 = vmatprep.subr.mxu0 %v989_v0  ;;  %707 = vmatpush3.msra.mxu1 %v411_v50 }
  0x5f   : > { %678 = vmatpush3.msra.mxu0 %v321_v28  ;;  %v282_v45 = vadd.f32 %v281_v41, %v250_v39  ;;  %708 = vmatprep.subr.mxu1 %v989_v0  ;;  %v270_v28 = vld [vmem:[%s1147_s6 + $0xf8] sm:$0xff]  ;;  %v404_v41 = vld [vmem:[#allocation8 + $0x8] sm:$0xff] }
  0x60   : > { %679 = vmatprep.subr.mxu0 %v989_v0  ;;  %709 = vmatpush3.msra.mxu1 %v410_v53 }
  0x61   : > { %680 = vmatpush3.msra.mxu0 %v320_v32  ;;  %v283_v49 = vadd.f32 %v282_v45, %v251_v43  ;;  %710 = vmatprep.subr.mxu1 %v989_v0 }
  0x62   : > { %681 = vmatprep.subr.mxu0 %v989_v0  ;;  %711 = vmatpush3.msra.mxu1 %v409_v56 }
  0x63   : > { %682 = vmatpush3.msra.mxu0 %v319_v36  ;;  %v284_v52 = vadd.f32 %v283_v49, %v252_v47  ;;  %712 = vmatprep.subr.mxu1 %v989_v0  ;;  %v271_v36 = vld [vmem:[#allocation2] sm:$0x1] }
  0x64   : > { %683 = vmatprep.subr.mxu0 %v989_v0  ;;  %713 = vmatpush3.msra.mxu1 %v408_v59 }
  0x65   : > { %684 = vmatpush3.msra.mxu0 %v318_v40  ;;  %v285_v55 = vadd.f32 %v284_v52, %v253_v51  ;;  %714 = vmatprep.subr.mxu1 %v989_v0 }
  0x66   : > { %685 = vmatprep.subr.mxu0 %v989_v0  ;;  %715 = vmatpush3.msra.mxu1 %v407_v62 }
  0x67   : > { %686 = vmatpush3.msra.mxu0 %v317_v44  ;;  %v286_v58 = vadd.f32 %v285_v55, %v254_v54  ;;  %716 = vmatprep.subr.mxu1 %v989_v0 }
  0x68   : > { %687 = vmatprep.subr.mxu0 %v989_v0  ;;  %717 = vmatpush3.msra.mxu1 %v406_v2 }
  0x69   : > { %688 = vmatpush3.msra.mxu0 %v316_v48  ;;  %v287_v61 = vadd.f32 %v286_v58, %v255_v57  ;;  %718 = vmatprep.subr.mxu1 %v989_v0 }
  0x6a   : > { %719 = vmatpush3.msra.mxu1 %v405_v5 }
  0x6b   : > { %v288_v1 = vadd.f32 %v287_v61, %v256_v60  ;;  %720 = vmatprep.subr.mxu1 %v989_v0 }
  0x6c   : > { %721 = vmatpush3.msra.mxu1 %v404_v41 }
  0x6d   : > { %v289_v4 = vadd.f32 %v288_v1, %v257_v63  ;;  %722 = vmatprep.subr.mxu1 %v989_v0 }
  0x6e   : > { %723 = vmatpush3.msra.mxu1 %v403_v42 }
  0x6f   : > { %v290_v7 = vadd.f32 %v289_v4, %v258_v3 }
  0x71   : > { %v291_v9 = vadd.f32 %v290_v7, %v259_v6 }
  0x73   : > { %v292_v11 = vadd.f32 %v291_v9, %v260_v8 }
  0x75   : > { %v293_v13 = vadd.f32 %v292_v11, %v261_v10 }
  0x77   : > { %v294_v15 = vadd.f32 %v293_v13, %v262_v12 }
  0x79   : > { %v295_v17 = vadd.f32 %v294_v15, %v263_v14 }
  0x7b   : > { %v296_v19 = vadd.f32 %v295_v17, %v264_v16 }
  0x7d   : > { %v297_v21 = vadd.f32 %v296_v19, %v265_v18 }
  0x7f   : > { %v298_v23 = vadd.f32 %v297_v21, %v266_v20 }
  0x81   : > { %v299_v25 = vadd.f32 %v298_v23, %v267_v22 }
  0x83   : > { %v300_v27 = vadd.f32 %v299_v25, %v268_v24 }
  0x85   : > { %v301_v29 = vadd.f32 %v300_v27, %v269_v26 }
  0x87   : > { %v302_v30 = vadd.f32 %v301_v29, %v270_v28 }
  0x89   : > { %v303_v31 = vrot.slane %v302_v30, 4 }
  0x8b   : > { %v304_v32 = vadd.f32 %v303_v31, %v302_v30 }
  0x8d   : > { %v305_v33 = vrot.slane %v304_v32, 2 }
  0x8f   : > { %v306_v34 = vadd.f32 %v305_v33, %v304_v32 }
  0x91   : > { %v307_v35 = vrot.slane %v306_v34, 1 }
  0x93   : > { %v308_v37 = vadd.f32 %v307_v35, %v306_v34 }
  0x95   : > { %v309_v38 = vadd.f32 %v308_v37, %v271_v36 }
  0x97   : > { %310 = vst [vmem:[#allocation2] sm:$0x1] %v309_v38 }
  0x9e   : > { %v314_v39 = vld [vmem:[#allocation2] sm:$0x1] }
  0x9f   : > { %v315_v40 = vmul.f32 0.00390625, %v314_v39 }
  0xa1   : > { %690 = vmatmul.mubr.f32.vlgmr.msra.gmra.mxu0 %v315_v40 }
 0x161   : > { %v398_v43 = vpop.f32.mrf.mxu0 }
 0x162   : > { %v402_v44 = vmax.f32 %v398_v43, 0.0 }
 0x163   : > { %v691_v45 = vpop.f32.mrf.mxu0 }
 0x164   : > { %725 = vmatmul.mubr.f32.vlgmr.msra.gmra.mxu1 %v402_v44 }
 0x224   : > { %v485_v46 = vpop.f32.mrf.mxu1 }
 0x225   : > { %v618_v47 = vmul.f32 -1.442695, %v485_v46 }
 0x226   : > { %v726_v48 = vpop.f32.mrf.mxu1 }
 0x227   : > { %814 = vpow2.f32 %v618_v47 }
 0x234   : > { %v815_v49 = vpop.eup %814 }
 0x235   : > { %v492_v50 = vadd.f32 1.0, %v815_v49 }
 0x237   : > { %816 = vrcp.f32 %v492_v50 }
 0x244   : > { %v817_v0 = vpop.eup %816 }
 0x245   : > { %495 = vst [vmem:[%s232_s22] sm:$0x1] %v817_v0 }
 0x246   : > { %911 = shalt.err (!%p908_p2)
}
 0x247   : > { %s912_s18 = scalar_lea.hbm %s1229_s8, 16  ;;  %s916_s26 = scalar_lea.hbm %s1274_s3, 32 }
 0x248   : > { %p913_p9 = scmp.ne.s32.totalorder %s1229_s8, %s912_s18  ;;  %p917_p0 = scmp.lt.s32.totalorder %s1229_s8, %s1274_s3 }
 0x249   : > { %p918_p7 = scmp.lt.s32.totalorder %s916_s26, %s912_s18 }
 0x24a   : > { %p914_p12 = pnand %p913_p9, %p1113_p3 }
 0x24b   : > { %p919_p5 = por %p918_p7, %p917_p0 }
 0x24c   : > { %p915_p13 = pneg %p914_p12 }
 0x24e   : > { %p920_p1 = pnand %p919_p5, %p915_p13 }
 0x250   : > { %923 = shalt.err (!%p920_p1)
}
 0x251   : > { %737 = dma.vmem_to_hbm [thread:$0]  (%p1113_p3), %s510_s24, 16, %s1229_s8, %s497_s9  }
 0x252 PF: > { %s521_s6 = sand.u32 1, %s962_s12   ;;  %p1285_p4 = scmp.ne.s32.totalorder %s1279_s23, 0 }
 0x253   : > { %p1286_p6 = scmp.ge.s32.totalorder %s982_s17, 2  ;;  %s522_s20 = scalar_lea.sflag [#allocation5], %s521_s6 }
 0x255   : > { %p751_p8 = pnand %p1286_p6, %p1285_p4 }
 0x257   : > { %p752_p10 = pneg %p751_p8 }
 0x259   : > { %957 = dma.done.wait (%p752_p10), %s522_s20, 16  }
 0x25a   : > { %959 = vsyncadd (%p752_p10), %s522_s20, 4294967280  ;;  %s20_s17 = sadd.s32 1, %s982_s17   ;;  %s1287_s12 = smov %s966_s13 }
 0x25b   : > { %p17_p11 = scmp.ge.s32.totalorder %s20_s17, 4   ;;  %s1288_s13 = smov %s970_s14 }
 0x25c   : > { %s1289_s14 = smov %s1122_s29  ;;  %s1290_s15 = smov %s978_s16 }
 0x25d   : > { %s1291_s16 = smov %s1293_s11  ;;  %19 = sbr.rel (!%p17_p11) target bundleno = 7 (0x7), region = 93 }
 0x262   :  { %526 = vsyncpa [#allocation4], 1 }
 0x263   :  { %528 = vsyncpa [#allocation4 + $0x1], 1 }
 0x264   :  { %529 = vsyncpa [#allocation7], 1 }
 0x265   :  { %530 = vsyncpa [#allocation5], 1 }
 0x266   :  { %532 = vsyncpa [#allocation5 + $0x1], 1 }

</bundles_post_ra>
